<compile_context>
chip_gen: v7x
topology: tpu7x:2x2x1
jax: 0.10.0
libtpu: 0.0.40
codegen_flags: <defaults>
</compile_context>

<pallas_src>
import jax
import jax.numpy as jnp
from jax.experimental import pallas as pl
from jax.experimental.pallas import tpu as pltpu


def _round_up(n, m):
    return ((n + m - 1) // m) * m


def _mlp_kernel(x_ref, w1_ref, b1_ref, w2_ref, b2_ref, w3_ref, b3_ref, o_ref):
    # Three MXU matmuls (bf16 operands, f32 accumulation) + f32 bias/ReLU on the VPU.
    x = x_ref[...]                                                      # bf16 [TB, Fp]
    h1 = jnp.dot(x, w1_ref[...], preferred_element_type=jnp.float32)   # f32  [TB, Hp]
    h1 = jnp.maximum(h1 + b1_ref[...], 0.0)
    h2 = jnp.dot(h1.astype(jnp.bfloat16), w2_ref[...],
                 preferred_element_type=jnp.float32)                    # f32  [TB, Hp]
    h2 = jnp.maximum(h2 + b2_ref[...], 0.0)
    out = jnp.dot(h2.astype(jnp.bfloat16), w3_ref[...],
                  preferred_element_type=jnp.float32) + b3_ref[...]     # f32  [TB, Op]
    o_ref[...] = out.astype(o_ref.dtype)


def baseline_forward(x_nchw, params):
    """Forward pass of BaseLine. x_nchw: [B, C, H, W] float32. Returns [B, out] float32."""
    w1, b1, w2, b2, w3, b3 = params
    B = x_nchw.shape[0]
    F = x_nchw.shape[1] * x_nchw.shape[2] * x_nchw.shape[3]
    H = w1.shape[1]
    O = w3.shape[1]

    x_flat = x_nchw.reshape(B, F)                       # nn.Flatten() (NCHW row-major)

    # ---- layout padding (wrapper-side, zero-padded => math unchanged) -------------
    F_p = _round_up(F, 128)                             # contraction dim, lane of x
    H_p = _round_up(H, 128)                             # hidden lane dim
    O_p = _round_up(O, 128)                             # output lane dim (dense vst)
    TILE_B = 128 if B >= 128 else _round_up(B, 8)       # sublane / MXU-M granularity
    B_p = _round_up(B, TILE_B)

    def pad2(a, rows, cols):
        return jnp.pad(a, ((0, rows - a.shape[0]), (0, cols - a.shape[1])))

    # bf16 matmul operands; f32 biases for VPU bias/ReLU.
    x_p = pad2(x_flat, B_p, F_p).astype(jnp.bfloat16)
    w1_p = pad2(w1, F_p, H_p).astype(jnp.bfloat16)
    w2_p = pad2(w2, H_p, H_p).astype(jnp.bfloat16)
    w3_p = pad2(w3, H_p, O_p).astype(jnp.bfloat16)
    b1_p = pad2(b1, 1, H_p).astype(jnp.float32)
    b2_p = pad2(b2, 1, H_p).astype(jnp.float32)
    b3_p = pad2(b3, 1, O_p).astype(jnp.float32)

    grid = (B_p // TILE_B,)
    resident = lambda shape: pl.BlockSpec(shape, lambda i: (0,) * len(shape))

    out_p = pl.pallas_call(
        _mlp_kernel,
        out_shape=jax.ShapeDtypeStruct((B_p, O_p), jnp.float32),
        grid=grid,
        in_specs=[
            pl.BlockSpec((TILE_B, F_p), lambda i: (i, 0)),   # x: tiled on batch
            resident((F_p, H_p)), resident((1, H_p)),        # w1, b1: VMEM-resident
            resident((H_p, H_p)), resident((1, H_p)),        # w2, b2
            resident((H_p, O_p)), resident((1, O_p)),        # w3, b3
        ],
        out_specs=pl.BlockSpec((TILE_B, O_p), lambda i: (i, 0)),
        compiler_params=pltpu.CompilerParams(
            dimension_semantics=("parallel",),               # megacore / 2-TC sharding
            vmem_limit_bytes=64 << 20,                       # headroom if F/H scale up
        ),
    )(x_p, w1_p, b1_p, w2_p, b2_p, w3_p, b3_p)

    return out_p[:B, :O]


def init_params(key, in_features, hidden_units, out_features):
    """Deterministic init mirroring nn.Linear default (uniform(-1/sqrt(fan_in), +1/sqrt(fan_in)))."""
    ks = jax.random.split(key, 6)

    def linear(kw, kb, fan_in, fan_out):
        bound = 1.0 / jnp.sqrt(jnp.float32(fan_in))
        w = jax.random.uniform(kw, (fan_in, fan_out), jnp.float32, -bound, bound)
        b = jax.random.uniform(kb, (1, fan_out), jnp.float32, -bound, bound)
        return w, b

    w1, b1 = linear(ks[0], ks[1], in_features, hidden_units)
    w2, b2 = linear(ks[2], ks[3], hidden_units, hidden_units)
    w3, b3 = linear(ks[4], ks[5], hidden_units, out_features)
    return (w1, b1, w2, b2, w3, b3)


if __name__ == "__main__":
    key = jax.random.PRNGKey(0)
    k_x, k_p = jax.random.split(key)

    # Small shapes consistent with the module: x [2, 4, 16, 16] -> input=1024, hidden=32, output=10
    B, C, Hh, Ww = 2, 4, 16, 16
    in_features = C * Hh * Ww
    hidden_units = 32
    out_features = 10

    x = jax.random.normal(k_x, (B, C, Hh, Ww), jnp.float32)
    params = init_params(k_p, in_features, hidden_units, out_features)

    y = baseline_forward(x, params)
    jax.block_until_ready(y)
    assert y.shape == (B, out_features)

    w1, b1, w2, b2, w3, b3 = params
    xf = x.reshape(B, -1)

    # Matched-precision reference (same bf16 operand cast, f32 accumulation): tight check.
    def mm(a, w):
        return jnp.dot(a.astype(jnp.bfloat16), w.astype(jnp.bfloat16),
                       preferred_element_type=jnp.float32)
    ref_bf16 = jnp.maximum(mm(xf, w1) + b1, 0.0)
    ref_bf16 = jnp.maximum(mm(ref_bf16, w2) + b2, 0.0)
    ref_bf16 = mm(ref_bf16, w3) + b3
    assert jnp.allclose(y, ref_bf16, atol=1e-3, rtol=1e-3), "mismatch vs bf16 reference"

    # Full-f32 reference: loose sanity check (bf16 operands cost ~1e-2 abs accuracy).
    ref_f32 = jnp.maximum(xf @ w1 + b1, 0.0)
    ref_f32 = jnp.maximum(ref_f32 @ w2 + b2, 0.0)
    ref_f32 = ref_f32 @ w3 + b3
    assert jnp.allclose(y, ref_f32, atol=3e-2, rtol=3e-2), "mismatch vs f32 reference"

    print("KERNEL_OK")
</pallas_src>

<mosaic_0001>
module attributes {stable_mosaic.version = 11 : i64} {
  func.func @_mlp_kernel(%arg0: i32, %arg1: memref<8x1024xbf16, #tpu.memory_space<vmem>>, %arg2: memref<1024x128xbf16, #tpu.memory_space<vmem>>, %arg3: memref<1x128xf32, #tpu.memory_space<vmem>>, %arg4: memref<128x128xbf16, #tpu.memory_space<vmem>>, %arg5: memref<1x128xf32, #tpu.memory_space<vmem>>, %arg6: memref<128x128xbf16, #tpu.memory_space<vmem>>, %arg7: memref<1x128xf32, #tpu.memory_space<vmem>>, %arg8: memref<8x128xf32, #tpu.memory_space<vmem>>) attributes {dimension_semantics = [#tpu.dimension_semantics<parallel>], iteration_bounds = array<i64: 1>, scalar_prefetch = 0 : i64, scratch_operands = 0 : i64, tpu.core_type = #tpu.core_type<tc>, window_params = [{transform_indices = @transform_0, window_bounds = array<i64: 8, 1024>}, {pipeline_mode = #tpu.pipeline_mode<synchronous>, transform_indices = @transform_1, window_bounds = array<i64: 1024, 128>}, {pipeline_mode = #tpu.pipeline_mode<synchronous>, transform_indices = @transform_2, window_bounds = array<i64: 1, 128>}, {pipeline_mode = #tpu.pipeline_mode<synchronous>, transform_indices = @transform_3, window_bounds = array<i64: 128, 128>}, {pipeline_mode = #tpu.pipeline_mode<synchronous>, transform_indices = @transform_4, window_bounds = array<i64: 1, 128>}, {pipeline_mode = #tpu.pipeline_mode<synchronous>, transform_indices = @transform_5, window_bounds = array<i64: 128, 128>}, {pipeline_mode = #tpu.pipeline_mode<synchronous>, transform_indices = @transform_6, window_bounds = array<i64: 1, 128>}, {transform_indices = @transform_7, window_bounds = array<i64: 8, 128>}]} {
    %c0 = arith.constant 0 : index
    %c0_0 = arith.constant 0 : index
    %0 = vector.load %arg1[%c0, %c0_0] : memref<8x1024xbf16, #tpu.memory_space<vmem>>, vector<8x1024xbf16>
    %c0_1 = arith.constant 0 : index
    %c0_2 = arith.constant 0 : index
    %1 = vector.load %arg2[%c0_1, %c0_2] : memref<1024x128xbf16, #tpu.memory_space<vmem>>, vector<1024x128xbf16>
    %cst = arith.constant dense<0.000000e+00> : vector<8x128xf32>
    %2 = tpu.matmul %0, %1, %cst {dimension_numbers = #tpu.dot_dimension_numbers<[1], [0], [0], [1], [0, 0, 1, 1], [], []>} : vector<8x1024xbf16>, vector<1024x128xbf16>, vector<8x128xf32> -> vector<8x128xf32>
    %c0_3 = arith.constant 0 : index
    %c0_4 = arith.constant 0 : index
    %3 = vector.load %arg3[%c0_3, %c0_4] : memref<1x128xf32, #tpu.memory_space<vmem>>, vector<1x128xf32>
    %4 = vector.broadcast %3 : vector<1x128xf32> to vector<8x128xf32>
    %5 = arith.addf %2, %4 : vector<8x128xf32>
    %cst_5 = arith.constant 0.000000e+00 : f32
    %6 = vector.broadcast %cst_5 : f32 to vector<8x128xf32>
    %7 = arith.maximumf %5, %6 : vector<8x128xf32>
    %8 = arith.truncf %7 : vector<8x128xf32> to vector<8x128xbf16>
    %c0_6 = arith.constant 0 : index
    %c0_7 = arith.constant 0 : index
    %9 = vector.load %arg4[%c0_6, %c0_7] : memref<128x128xbf16, #tpu.memory_space<vmem>>, vector<128x128xbf16>
    %cst_8 = arith.constant dense<0.000000e+00> : vector<8x128xf32>
    %10 = tpu.matmul %8, %9, %cst_8 {dimension_numbers = #tpu.dot_dimension_numbers<[1], [0], [0], [1], [0, 0, 1, 1], [], []>} : vector<8x128xbf16>, vector<128x128xbf16>, vector<8x128xf32> -> vector<8x128xf32>
    %c0_9 = arith.constant 0 : index
    %c0_10 = arith.constant 0 : index
    %11 = vector.load %arg5[%c0_9, %c0_10] : memref<1x128xf32, #tpu.memory_space<vmem>>, vector<1x128xf32>
    %12 = vector.broadcast %11 : vector<1x128xf32> to vector<8x128xf32>
    %13 = arith.addf %10, %12 : vector<8x128xf32>
    %cst_11 = arith.constant 0.000000e+00 : f32
    %14 = vector.broadcast %cst_11 : f32 to vector<8x128xf32>
    %15 = arith.maximumf %13, %14 : vector<8x128xf32>
    %16 = arith.truncf %15 : vector<8x128xf32> to vector<8x128xbf16>
    %c0_12 = arith.constant 0 : index
    %c0_13 = arith.constant 0 : index
    %17 = vector.load %arg6[%c0_12, %c0_13] : memref<128x128xbf16, #tpu.memory_space<vmem>>, vector<128x128xbf16>
    %cst_14 = arith.constant dense<0.000000e+00> : vector<8x128xf32>
    %18 = tpu.matmul %16, %17, %cst_14 {dimension_numbers = #tpu.dot_dimension_numbers<[1], [0], [0], [1], [0, 0, 1, 1], [], []>} : vector<8x128xbf16>, vector<128x128xbf16>, vector<8x128xf32> -> vector<8x128xf32>
    %c0_15 = arith.constant 0 : index
    %c0_16 = arith.constant 0 : index
    %19 = vector.load %arg7[%c0_15, %c0_16] : memref<1x128xf32, #tpu.memory_space<vmem>>, vector<1x128xf32>
    %20 = vector.broadcast %19 : vector<1x128xf32> to vector<8x128xf32>
    %21 = arith.addf %18, %20 : vector<8x128xf32>
    %c0_17 = arith.constant 0 : index
    %c0_18 = arith.constant 0 : index
    %22 = vector.load %arg8[%c0_17, %c0_18] : memref<8x128xf32, #tpu.memory_space<vmem>>, vector<8x128xf32>
    tpu.vector_store %arg8[%c0_17, %c0_18], %21 {strides = array<i32>} : memref<8x128xf32, #tpu.memory_space<vmem>>, vector<8x128xf32>,
    return
  }
  func.func @transform_0(%arg0: i32) -> (i32, i32) {
    %c0_i32 = arith.constant 0 : i32
    %c0_i32_0 = arith.constant 0 : i32
    return %arg0, %c0_i32 : i32, i32
  }
  func.func @transform_1(%arg0: i32) -> (i32, i32) {
    %c0_i32 = arith.constant 0 : i32
    %c0_i32_0 = arith.constant 0 : i32
    %c0_i32_1 = arith.constant 0 : i32
    return %c0_i32, %c0_i32_0 : i32, i32
  }
  func.func @transform_2(%arg0: i32) -> (i32, i32) {
    %c0_i32 = arith.constant 0 : i32
    %c0_i32_0 = arith.constant 0 : i32
    %c0_i32_1 = arith.constant 0 : i32
    return %c0_i32, %c0_i32_0 : i32, i32
  }
  func.func @transform_3(%arg0: i32) -> (i32, i32) {
    %c0_i32 = arith.constant 0 : i32
    %c0_i32_0 = arith.constant 0 : i32
    %c0_i32_1 = arith.constant 0 : i32
    return %c0_i32, %c0_i32_0 : i32, i32
  }
  func.func @transform_4(%arg0: i32) -> (i32, i32) {
    %c0_i32 = arith.constant 0 : i32
    %c0_i32_0 = arith.constant 0 : i32
    %c0_i32_1 = arith.constant 0 : i32
    return %c0_i32, %c0_i32_0 : i32, i32
  }
  func.func @transform_5(%arg0: i32) -> (i32, i32) {
    %c0_i32 = arith.constant 0 : i32
    %c0_i32_0 = arith.constant 0 : i32
    %c0_i32_1 = arith.constant 0 : i32
    return %c0_i32, %c0_i32_0 : i32, i32
  }
  func.func @transform_6(%arg0: i32) -> (i32, i32) {
    %c0_i32 = arith.constant 0 : i32
    %c0_i32_0 = arith.constant 0 : i32
    %c0_i32_1 = arith.constant 0 : i32
    return %c0_i32, %c0_i32_0 : i32, i32
  }
  func.func @transform_7(%arg0: i32) -> (i32, i32) {
    %c0_i32 = arith.constant 0 : i32
    %c0_i32_0 = arith.constant 0 : i32
    return %arg0, %c0_i32 : i32, i32
  }
}

</mosaic_0001>

<bundles_post_ra>
// kernel: tpu_custom_call.1
= control target key start
LH: loop header
LB: loop body
LE: loop exit
PB: predicated region body
PF: predicated region fallthrough
CT: control target
= control target key end

     0   :  { %12 = vsyncpa [#allocation3], 0  ;;  %s1769_s0 = inlined_call_operand.hbm [shape: bf16[8,1024], index: 0, kind: input, shape index: {}]   ;;  %s1770_s1 = inlined_call_operand.hbm [shape: bf16[1024,128], index: 1, kind: input, shape index: {}]   ;;  %s1771_s2 = inlined_call_operand.hbm [shape: f32[1,128], index: 2, kind: input, shape index: {}]   ;;  %s1772_s3 = inlined_call_operand.hbm [shape: bf16[128,128], index: 3, kind: input, shape index: {}]   ;;  %s1773_s4 = inlined_call_operand.hbm [shape: f32[1,128], index: 4, kind: input, shape index: {}]   ;;  %s1774_s5 = inlined_call_operand.hbm [shape: bf16[128,128], index: 5, kind: input, shape index: {}]   ;;  %s1775_s6 = inlined_call_operand.hbm [shape: f32[1,128], index: 6, kind: input, shape index: {}]   ;;  %s1776_s7 = inlined_call_operand.hbm [shape: f32[8,128], index: 7, kind: output, shape index: {}]  }
   0x1   :  { %13 = vsyncpa [#allocation6], 0 }
   0x2   :  { %14 = vsyncpa [#allocation9], 0 }
   0x3   :  { %15 = vsyncpa [#allocation12], 0 }
   0x4   :  { %16 = vsyncpa [#allocation4], 0  ;;  %s1594_s24 = smov [#allocation5]   ;;  %s1408_s28 = scalar_lea.hbm %s1770_s1, 8192 }
   0x5   :  { %s32_s25 = sshll.u32 %s1594_s24, 4  ;;  %p1409_p0 = scmp.ne.s32.totalorder %s1770_s1, %s1408_s28  ;;  %s33_s25 = int_to_ptr.vmem [resolvable:$true] %s32_s25 }
   0x6   :  { %p1412_p1 = scmp.lt.u32.totalorder %s1408_s28, %s1770_s1 }
   0x8   :  { %p1414_p2 = pnand %p1412_p1, %p1409_p0 }
   0xa   :  { %1417 = shalt.err (!%p1414_p2)
}
   0xb   :  { %s1418_s10 = scalar_lea.vmem %s33_s25, 8192  ;;  %p1423_p4 = scmp.lt.s32.totalorder %s33_s25, %s33_s25 }
   0xc   :  { %p1419_p3 = scmp.ne.s32.totalorder %s33_s25, %s1418_s10  ;;  %p1424_p5 = scmp.lt.s32.totalorder %s1418_s10, %s1418_s10 }
   0xe   :  { %p1425_p6 = por %p1424_p5, %p1423_p4 }
  0x10   :  { %p1426_p7 = pnand %p1425_p6, %p1419_p3 }
  0x12   :  { %1429 = shalt.err (!%p1426_p7)
}
  0x13   :  { %s1595_s11 = smov 64   ;;  %s1596_s12 = smov 4  }
  0x14   :  { %38 = dma.hbm_to_vmem [thread:$0]  %s1770_s1, 8192, %s33_s25, [#allocation6], %s1595_s11, %s1595_s11, %s1596_s12  }
  0x15   :  { %s1597_s15 = smov [#allocation8]   ;;  %s1598_s17 = smov [#allocation11]  }
  0x16   :  { %s54_s16 = sshll.u32 %s1597_s15, 4  ;;  %s76_s18 = sshll.u32 %s1598_s17, 4  ;;  %s55_s16 = int_to_ptr.vmem [resolvable:$true] %s54_s16  ;;  %s77_s18 = int_to_ptr.vmem [resolvable:$true] %s76_s18 }
  0x17   :  { %s1430_s21 = scalar_lea.hbm %s1772_s3, 1024 }
  0x18   :  { %p1431_p8 = scmp.ne.s32.totalorder %s1772_s3, %s1430_s21  ;;  %p1434_p9 = scmp.lt.u32.totalorder %s1430_s21, %s1772_s3 }
  0x1a   :  { %p1436_p10 = pnand %p1434_p9, %p1431_p8 }
  0x1c   :  { %1439 = shalt.err (!%p1436_p10)
}
  0x1d   :  { %s1440_s1 = scalar_lea.vmem %s55_s16, 1024  ;;  %p1445_p12 = scmp.lt.s32.totalorder %s55_s16, %s55_s16 }
  0x1e   :  { %p1441_p11 = scmp.ne.s32.totalorder %s55_s16, %s1440_s1  ;;  %p1446_p13 = scmp.lt.s32.totalorder %s1440_s1, %s1440_s1 }
  0x20   :  { %p1447_p0 = por %p1446_p13, %p1445_p12 }
  0x22   :  { %p1448_p1 = pnand %p1447_p0, %p1441_p11 }
  0x24   :  { %1451 = shalt.err (!%p1448_p1)
}
  0x25   :  { %60 = dma.hbm_to_vmem [thread:$0]  %s1772_s3, 1024, %s55_s16, [#allocation9], %s1595_s11, %s1595_s11, %s1596_s12  }
  0x26   :  { %s1452_s30 = scalar_lea.hbm %s1774_s5, 1024 }
  0x27   :  { %p1453_p2 = scmp.ne.s32.totalorder %s1774_s5, %s1452_s30  ;;  %p1456_p3 = scmp.lt.u32.totalorder %s1452_s30, %s1774_s5 }
  0x29   :  { %p1458_p4 = pnand %p1456_p3, %p1453_p2 }
  0x2b   :  { %1461 = shalt.err (!%p1458_p4)
}
  0x2c   :  { %s1462_s14 = scalar_lea.vmem %s77_s18, 1024  ;;  %p1467_p6 = scmp.lt.s32.totalorder %s77_s18, %s77_s18 }
  0x2d   :  { %p1463_p5 = scmp.ne.s32.totalorder %s77_s18, %s1462_s14  ;;  %p1468_p7 = scmp.lt.s32.totalorder %s1462_s14, %s1462_s14 }
  0x2f   :  { %p1469_p8 = por %p1468_p7, %p1467_p6 }
  0x31   :  { %p1470_p9 = pnand %p1469_p8, %p1463_p5 }
  0x33   :  { %1473 = shalt.err (!%p1470_p9)
}
  0x34   :  { %82 = dma.hbm_to_vmem [thread:$0]  %s1774_s5, 1024, %s77_s18, [#allocation12], %s1595_s11, %s1595_s11, %s1596_s12  }
  0x35   :  { %s1599_s16 = smov [#allocation2]   ;;  %s1600_s19 = smov [#allocation7]  }
  0x36   :  { %s23_s17 = sshll.u32 %s1599_s16, 4  ;;  %s45_s20 = sshll.u32 %s1600_s19, 4  ;;  %s24_s17 = int_to_ptr.vmem [resolvable:$true] %s23_s17  ;;  %s46_s20 = int_to_ptr.vmem [resolvable:$true] %s45_s20 }
  0x37   :  { %s1474_s23 = scalar_lea.hbm %s1769_s0, 512 }
  0x38   :  { %p1475_p10 = scmp.ne.s32.totalorder %s1769_s0, %s1474_s23  ;;  %p1478_p11 = scmp.lt.u32.totalorder %s1474_s23, %s1769_s0 }
  0x3a   :  { %p1480_p12 = pnand %p1478_p11, %p1475_p10 }
  0x3c   :  { %1483 = shalt.err (!%p1480_p12)
}
  0x3d   :  { %s1484_s5 = scalar_lea.vmem %s24_s17, 512  ;;  %p1489_p0 = scmp.lt.s32.totalorder %s24_s17, %s24_s17 }
  0x3e   :  { %p1485_p13 = scmp.ne.s32.totalorder %s24_s17, %s1484_s5  ;;  %p1490_p1 = scmp.lt.s32.totalorder %s1484_s5, %s1484_s5 }
  0x40   :  { %p1491_p2 = por %p1490_p1, %p1489_p0 }
  0x42   :  { %p1492_p3 = pnand %p1491_p2, %p1485_p13 }
  0x44   :  { %1495 = shalt.err (!%p1492_p3)
}
  0x45   :  { %26 = dma.hbm_to_vmem [thread:$0]  %s1769_s0, 512, %s24_s17, [#allocation3]  }
  0x46   :  { %s1496_s28 = scalar_lea.hbm %s1771_s2, 16 }
  0x47   :  { %p1497_p4 = scmp.ne.s32.totalorder %s1771_s2, %s1496_s28  ;;  %p1500_p5 = scmp.lt.u32.totalorder %s1496_s28, %s1771_s2 }
  0x49   :  { %p1502_p6 = pnand %p1500_p5, %p1497_p4 }
  0x4b   :  { %1505 = shalt.err (!%p1502_p6)
}
  0x4c   :  { %s1506_s10 = scalar_lea.vmem %s46_s20, 16  ;;  %s1510_s13 = scalar_lea.vmem %s46_s20, 32 }
  0x4d   :  { %p1507_p7 = scmp.ne.s32.totalorder %s46_s20, %s1506_s10  ;;  %p1511_p8 = scmp.lt.s32.totalorder %s46_s20, %s46_s20 }
  0x4e   :  { %p1512_p9 = scmp.lt.s32.totalorder %s1510_s13, %s1506_s10 }
  0x50   :  { %p1513_p10 = por %p1512_p9, %p1511_p8 }
  0x52   :  { %p1514_p11 = pnand %p1513_p10, %p1507_p7 }
  0x54   :  { %1517 = shalt.err (!%p1514_p11)
}
  0x55   :  { %48 = dma.hbm_to_vmem [thread:$0]  %s1771_s2, 16, %s46_s20, [#allocation6]  }
  0x56   :  { %s1601_s3 = smov [#allocation10]   ;;  %s1602_s16 = smov [#allocation13]  }
  0x57   :  { %s67_s15 = sshll.u32 %s1601_s3, 4  ;;  %s89_s17 = sshll.u32 %s1602_s16, 4  ;;  %s68_s15 = int_to_ptr.vmem [resolvable:$true] %s67_s15  ;;  %s90_s17 = int_to_ptr.vmem [resolvable:$true] %s89_s17 }
  0x58   :  { %s1518_s22 = scalar_lea.hbm %s1773_s4, 16 }
  0x59   :  { %p1519_p12 = scmp.ne.s32.totalorder %s1773_s4, %s1518_s22  ;;  %p1522_p13 = scmp.lt.u32.totalorder %s1518_s22, %s1773_s4 }
  0x5b   :  { %p1524_p0 = pnand %p1522_p13, %p1519_p12 }
  0x5d   :  { %1527 = shalt.err (!%p1524_p0)
}
  0x5e   :  { %s1528_s2 = scalar_lea.vmem %s68_s15, 16  ;;  %s1532_s20 = scalar_lea.vmem %s68_s15, 32 }
  0x5f   :  { %p1529_p1 = scmp.ne.s32.totalorder %s68_s15, %s1528_s2  ;;  %p1533_p2 = scmp.lt.s32.totalorder %s68_s15, %s68_s15 }
  0x60   :  { %p1534_p3 = scmp.lt.s32.totalorder %s1532_s20, %s1528_s2 }
  0x62   :  { %p1535_p4 = por %p1534_p3, %p1533_p2 }
  0x64   :  { %p1536_p5 = pnand %p1535_p4, %p1529_p1 }
  0x66   :  { %1539 = shalt.err (!%p1536_p5)
}
  0x67   :  { %70 = dma.hbm_to_vmem [thread:$0]  %s1773_s4, 16, %s68_s15, [#allocation9]  }
  0x68   :  { %s1540_s18 = scalar_lea.hbm %s1775_s6, 16 }
  0x69   :  { %p1541_p6 = scmp.ne.s32.totalorder %s1775_s6, %s1540_s18  ;;  %p1544_p7 = scmp.lt.u32.totalorder %s1540_s18, %s1775_s6 }
  0x6b   :  { %p1546_p8 = pnand %p1544_p7, %p1541_p6 }
  0x6d   :  { %1549 = shalt.err (!%p1546_p8)
}
  0x6e   :  { %s1550_s8 = scalar_lea.vmem %s90_s17, 16  ;;  %s1554_s9 = scalar_lea.vmem %s90_s17, 32 }
  0x6f   :  { %p1551_p9 = scmp.ne.s32.totalorder %s90_s17, %s1550_s8  ;;  %p1555_p10 = scmp.lt.s32.totalorder %s90_s17, %s90_s17 }
  0x70   :  { %p1556_p11 = scmp.lt.s32.totalorder %s1554_s9, %s1550_s8 }
  0x72   :  { %p1557_p12 = por %p1556_p11, %p1555_p10 }
  0x74   :  { %p1558_p13 = pnand %p1557_p12, %p1551_p9 }
  0x76   :  { %1561 = shalt.err (!%p1558_p13)
}
  0x77   :  { %92 = dma.hbm_to_vmem [thread:$0]  %s1775_s6, 16, %s90_s17, [#allocation12]  }
  0x78   :  { %1584 = dma.done.wait [#allocation3], 512  }
  0x79   :  { %1585 = vsyncadd [#allocation3], 4294966784 }
  0x7a   :  { %1586 = dma.done.wait [#allocation6], 8208  }
  0x7b   :  { %1587 = vsyncadd [#allocation6], 4294959088 }
  0x7c   :  { %1588 = dma.done.wait [#allocation9], 1040  }
  0x7d   :  { %1589 = vsyncadd [#allocation9], 4294966256 }
  0x7e   :  { %1590 = dma.done.wait [#allocation12], 1040  }
  0x7f   :  { %1591 = vsyncadd [#allocation12], 4294966256  ;;  %v1320_v0 = vld [vmem:[#allocation5 + $0x40] sm:$0xff]   ;;  %v1324_v4 = vld [vmem:[#allocation5 + $0x48] sm:$0xff]   ;;  %vm1604_vm0 = vmmov 0   ;;  %s1605_s6 = smov [#allocation14]  }
  0x80   :  { %v1321_v1 = vld [vmem:[#allocation5 + $0xc0] sm:$0xff]   ;;  %1162 = vmatprep.subr.bf16.mxu0 %v1320_v0  ;;  %v1325_v5 = vld [vmem:[#allocation5 + $0xc8] sm:$0xff]   ;;  %v1328_v8 = vld [vmem:[#allocation5 + $0x50] sm:$0xff]   ;;  %s1059_s13 = sshll.u32 %s1605_s6, 4  ;;  %s1060_s13 = int_to_ptr.vmem [resolvable:$true] %s1059_s13 }
  0x81   :  { %v1322_v2 = vld [vmem:[#allocation5] sm:$0xff]   ;;  %1184 = vmatprep.subr.bf16.mxu1 %v1321_v1  ;;  %v1326_v6 = vld [vmem:[#allocation5 + $0x8] sm:$0xff]   ;;  %v1329_v9 = vld [vmem:[#allocation5 + $0xd0] sm:$0xff]   ;;  %s1562_s0 = scalar_lea.vmem %s1060_s13, 128  ;;  %p1567_p1 = scmp.lt.s32.totalorder %s1060_s13, %s1060_s13 }
  0x82   :  { %v1323_v3 = vld [vmem:[#allocation5 + $0x80] sm:$0xff]   ;;  %1163 = vmatpush3.bf16.msra.mxu0 %v1322_v2  ;;  %v1327_v7 = vld [vmem:[#allocation5 + $0x88] sm:$0xff]   ;;  %v1330_v10 = vld [vmem:[#allocation5 + $0x10] sm:$0xff]   ;;  %p1563_p0 = scmp.ne.s32.totalorder %s1060_s13, %s1562_s0  ;;  %p1568_p2 = scmp.lt.s32.totalorder %s1562_s0, %s1562_s0 }
  0x83   :  { %1185 = vmatpush3.bf16.msra.mxu1 %v1323_v3  ;;  %1164 = vmatprep.subr.bf16.mxu0 %v1324_v4  ;;  %v1331_v11 = vld [vmem:[#allocation5 + $0x90] sm:$0xff]   ;;  %v1332_v12 = vld [vmem:[#allocation5 + $0x58] sm:$0xff]   ;;  %v1336_v16 = vld [vmem:[#allocation5 + $0x60] sm:$0xff]  }
  0x84   :  { %1186 = vmatprep.subr.bf16.mxu1 %v1325_v5  ;;  %v1333_v13 = vld [vmem:[#allocation5 + $0xd8] sm:$0xff]   ;;  %v1337_v17 = vld [vmem:[#allocation5 + $0xe0] sm:$0xff]   ;;  %v1340_v20 = vld [vmem:[#allocation5 + $0x68] sm:$0xff]   ;;  %p1569_p3 = por %p1568_p2, %p1567_p1 }
  0x85   :  { %v1334_v14 = vld [vmem:[#allocation5 + $0x18] sm:$0xff]   ;;  %v1338_v18 = vld [vmem:[#allocation5 + $0x20] sm:$0xff]   ;;  %v1341_v21 = vld [vmem:[#allocation5 + $0xe8] sm:$0xff]  }
  0x86   :  { %1165 = vmatpush3.bf16.msra.mxu0 %v1326_v6  ;;  %v1335_v15 = vld [vmem:[#allocation5 + $0x98] sm:$0xff]   ;;  %v1339_v19 = vld [vmem:[#allocation5 + $0xa0] sm:$0xff]   ;;  %v1342_v22 = vld [vmem:[#allocation5 + $0x28] sm:$0xff]   ;;  %p1570_p4 = pnand %p1569_p3, %p1563_p0 }
  0x87   :  { %1187 = vmatpush3.bf16.msra.mxu1 %v1327_v7  ;;  %1166 = vmatprep.subr.bf16.mxu0 %v1328_v8  ;;  %v1343_v23 = vld [vmem:[#allocation5 + $0xa8] sm:$0xff]   ;;  %v1344_v24 = vld [vmem:[#allocation5 + $0x70] sm:$0xff]   ;;  %v1348_v28 = vld [vmem:[#allocation5 + $0x78] sm:$0xff]  }
  0x88   :  { %1188 = vmatprep.subr.bf16.mxu1 %v1329_v9  ;;  %v1345_v25 = vld [vmem:[#allocation5 + $0xf0] sm:$0xff]   ;;  %v1349_v29 = vld [vmem:[#allocation5 + $0xf8] sm:$0xff]   ;;  %v115_v32 = vld [vmem:[#allocation2] sm:$0xff] }
  0x89   :  { %v1346_v26 = vld [vmem:[#allocation5 + $0x30] sm:$0xff]   ;;  %v1350_v30 = vld [vmem:[#allocation5 + $0x38] sm:$0xff]   ;;  %v116_v33 = vld [vmem:[#allocation2 + $0x8] sm:$0xff]  ;;  %v1072_v34 = vcombine.low %v115_v32, %v115_v32  ;;  %v1073_v35 = vcombine.high %v115_v32, %v115_v32 }
  0x8a   :  { %1167 = vmatpush3.bf16.msra.mxu0 %v1330_v10  ;;  %v1347_v27 = vld [vmem:[#allocation5 + $0xb0] sm:$0xff]   ;;  %v1351_v31 = vld [vmem:[#allocation5 + $0xb8] sm:$0xff]   ;;  %v1074_v36 = vcombine.low %v116_v33, %v116_v33  ;;  %v1075_v37 = vcombine.high %v116_v33, %v116_v33  ;;  %v1356_v38 = vld [vmem:[#allocation5 + $0x140] sm:$0xff]  }
  0x8b   :  { %1189 = vmatpush3.bf16.msra.mxu1 %v1331_v11  ;;  %1168 = vmatprep.subr.bf16.mxu0 %v1332_v12  ;;  %v1357_v39 = vld [vmem:[#allocation5 + $0x1c0] sm:$0xff]   ;;  %v1360_v42 = vld [vmem:[#allocation5 + $0x148] sm:$0xff]   ;;  %v1364_v46 = vld [vmem:[#allocation5 + $0x150] sm:$0xff]  }
  0x8c   :  { %1190 = vmatprep.subr.bf16.mxu1 %v1333_v13  ;;  %698 = vmatprep.mubr.bf16.mxu0 %v1073_v35  ;;  %v1358_v40 = vld [vmem:[#allocation5 + $0x100] sm:$0xff]   ;;  %v1361_v43 = vld [vmem:[#allocation5 + $0x1c8] sm:$0xff]   ;;  %v1365_v47 = vld [vmem:[#allocation5 + $0x1d0] sm:$0xff]   ;;  %v1603_v13 = vmov 0.0  }
  0x8d   :  { %738 = vmatprep.mubr.bf16.mxu1 %v1075_v37  ;;  %v1359_v41 = vld [vmem:[#allocation5 + $0x180] sm:$0xff]   ;;  %v1362_v44 = vld [vmem:[#allocation5 + $0x108] sm:$0xff]   ;;  %v1366_v48 = vld [vmem:[#allocation5 + $0x110] sm:$0xff]  }
  0x8e   :  { %1169 = vmatpush3.bf16.msra.mxu0 %v1334_v14  ;;  %v1363_v45 = vld [vmem:[#allocation5 + $0x188] sm:$0xff]   ;;  %v1367_v49 = vld [vmem:[#allocation5 + $0x190] sm:$0xff]   ;;  %v1368_v50 = vld [vmem:[#allocation5 + $0x158] sm:$0xff]  }
  0x8f   :  { %1191 = vmatpush3.bf16.msra.mxu1 %v1335_v15  ;;  %1170 = vmatprep.subr.bf16.mxu0 %v1336_v16  ;;  %v1369_v51 = vld [vmem:[#allocation5 + $0x1d8] sm:$0xff]   ;;  %v1372_v54 = vld [vmem:[#allocation5 + $0x160] sm:$0xff]   ;;  %v1376_v58 = vld [vmem:[#allocation5 + $0x168] sm:$0xff]  }
  0x90   :  { %1192 = vmatprep.subr.bf16.mxu1 %v1337_v17  ;;  %v1370_v52 = vld [vmem:[#allocation5 + $0x118] sm:$0xff]   ;;  %v1373_v55 = vld [vmem:[#allocation5 + $0x1e0] sm:$0xff]   ;;  %v1377_v59 = vld [vmem:[#allocation5 + $0x1e8] sm:$0xff]  }
  0x91   :  { %v1371_v53 = vld [vmem:[#allocation5 + $0x198] sm:$0xff]   ;;  %v1374_v56 = vld [vmem:[#allocation5 + $0x120] sm:$0xff]   ;;  %v1378_v60 = vld [vmem:[#allocation5 + $0x128] sm:$0xff]  }
  0x92   :  { %1171 = vmatpush3.bf16.msra.mxu0 %v1338_v18  ;;  %v1375_v57 = vld [vmem:[#allocation5 + $0x1a0] sm:$0xff]   ;;  %v1379_v61 = vld [vmem:[#allocation5 + $0x1a8] sm:$0xff]   ;;  %v1380_v62 = vld [vmem:[#allocation5 + $0x170] sm:$0xff]  }
  0x93   :  { %1193 = vmatpush3.bf16.msra.mxu1 %v1339_v19  ;;  %1172 = vmatprep.subr.bf16.mxu0 %v1340_v20  ;;  %v1381_v63 = vld [vmem:[#allocation5 + $0x1f0] sm:$0xff]   ;;  %v1384_v2 = vld [vmem:[#allocation5 + $0x178] sm:$0xff]   ;;  %v1392_v12 = vld [vmem:[#allocation8] sm:$0xff]  }
  0x94   :  { %1194 = vmatprep.subr.bf16.mxu1 %v1341_v21  ;;  %v1382_v0 = vld [vmem:[#allocation5 + $0x130] sm:$0xff]   ;;  %v1385_v3 = vld [vmem:[#allocation5 + $0x1f8] sm:$0xff]   ;;  %v1396_v17 = vld [vmem:[#allocation8 + $0x20] sm:$0xff]  }
  0x95   :  { %v1383_v1 = vld [vmem:[#allocation5 + $0x1b0] sm:$0xff]   ;;  %v1386_v4 = vld [vmem:[#allocation5 + $0x138] sm:$0xff]   ;;  %v1400_v21 = vld [vmem:[#allocation11] sm:$0xff]  }
  0x96   :  { %1173 = vmatpush3.bf16.msra.mxu0 %v1342_v22  ;;  %v1387_v5 = vld [vmem:[#allocation5 + $0x1b8] sm:$0xff]   ;;  %v117_v6 = vld [vmem:[#allocation2 + $0x10] sm:$0xff] }
  0x97   :  { %1195 = vmatpush3.bf16.msra.mxu1 %v1343_v23  ;;  %1174 = vmatprep.subr.bf16.mxu0 %v1344_v24  ;;  %v1076_v7 = vcombine.low %v117_v6, %v117_v6  ;;  %v1077_v8 = vcombine.high %v117_v6, %v117_v6  ;;  %v118_v9 = vld [vmem:[#allocation2 + $0x18] sm:$0xff]  ;;  %v1393_v14 = vld [vmem:[#allocation8 + $0x8] sm:$0xff]  }
  0x98   :  { %1196 = vmatprep.subr.bf16.mxu1 %v1345_v25  ;;  %v1078_v10 = vcombine.low %v118_v9, %v118_v9  ;;  %v1079_v11 = vcombine.high %v118_v9, %v118_v9  ;;  %v1394_v15 = vld [vmem:[#allocation8 + $0x10] sm:$0xff]   ;;  %v1395_v16 = vld [vmem:[#allocation8 + $0x18] sm:$0xff]   ;;  %v1397_v18 = vld [vmem:[#allocation8 + $0x28] sm:$0xff]  }
  0x99   :  { %v1398_v19 = vld [vmem:[#allocation8 + $0x30] sm:$0xff]   ;;  %v1399_v20 = vld [vmem:[#allocation8 + $0x38] sm:$0xff]   ;;  %v1404_v25 = vld [vmem:[#allocation11 + $0x20] sm:$0xff]  }
  0x9a   :  { %1175 = vmatpush3.bf16.msra.mxu0 %v1346_v26  ;;  %v1401_v22 = vld [vmem:[#allocation11 + $0x8] sm:$0xff]   ;;  %v1402_v23 = vld [vmem:[#allocation11 + $0x10] sm:$0xff]   ;;  %v1403_v24 = vld [vmem:[#allocation11 + $0x18] sm:$0xff]  }
  0x9b   :  { %1197 = vmatpush3.bf16.msra.mxu1 %v1347_v27  ;;  %1176 = vmatprep.subr.bf16.mxu0 %v1348_v28  ;;  %v1405_v26 = vld [vmem:[#allocation11 + $0x28] sm:$0xff]  }
  0x9c   :  { %1198 = vmatprep.subr.bf16.mxu1 %v1349_v29  ;;  %v1071_v29 = vld [vmem:[#allocation7] ss:$0 sm:$0xff] }
  0x9e   :  { %1177 = vmatpush3.bf16.msra.mxu0 %v1350_v30 }
  0x9f   :  { %1199 = vmatpush3.bf16.msra.mxu1 %v1351_v31  ;;  %1206 = vmatprep.subr.bf16.mxu0 %v1356_v38 }
  0xa0   :  { %1228 = vmatprep.subr.bf16.mxu1 %v1357_v39 }
  0xa1   :  { %699 = vmatmul.mubr.bf16.vlgmr.msra.gmra.mrb[0].mxu0 %v1072_v34 }
  0xa2   :  { %739 = vmatmul.mubr.bf16.vlgmr.msra.gmra.mrb[0].mxu1 %v1074_v36  ;;  %1207 = vmatpush3.bf16.msra.mxu0 %v1358_v40 }
  0xa3   :  { %1229 = vmatpush3.bf16.msra.mxu1 %v1359_v41  ;;  %1208 = vmatprep.subr.bf16.mxu0 %v1360_v42 }
  0xa4   :  { %1230 = vmatprep.subr.bf16.mxu1 %v1361_v43  ;;  %778 = vmatprep.mubr.bf16.mxu0 %v1077_v8 }
  0xa5   :  { %818 = vmatprep.mubr.bf16.mxu1 %v1079_v11 }
  0xa6   :  { %1209 = vmatpush3.bf16.msra.mxu0 %v1362_v44 }
  0xa7   :  { %1231 = vmatpush3.bf16.msra.mxu1 %v1363_v45  ;;  %1210 = vmatprep.subr.bf16.mxu0 %v1364_v46 }
  0xa8   :  { %1232 = vmatprep.subr.bf16.mxu1 %v1365_v47 }
  0xaa   :  { %1211 = vmatpush3.bf16.msra.mxu0 %v1366_v48 }
  0xab   :  { %1233 = vmatpush3.bf16.msra.mxu1 %v1367_v49  ;;  %1212 = vmatprep.subr.bf16.mxu0 %v1368_v50 }
  0xac   :  { %1234 = vmatprep.subr.bf16.mxu1 %v1369_v51 }
  0xae   :  { %1213 = vmatpush3.bf16.msra.mxu0 %v1370_v52 }
  0xaf   :  { %1235 = vmatpush3.bf16.msra.mxu1 %v1371_v53  ;;  %1214 = vmatprep.subr.bf16.mxu0 %v1372_v54  ;;  %v1406_v54 = vld [vmem:[#allocation11 + $0x30] sm:$0xff]  }
  0xb0   :  { %1236 = vmatprep.subr.bf16.mxu1 %v1373_v55  ;;  %v1407_v55 = vld [vmem:[#allocation11 + $0x38] sm:$0xff]  }
  0xb2   :  { %1215 = vmatpush3.bf16.msra.mxu0 %v1374_v56  ;;  %v1144_v56 = vld [vmem:[#allocation10] ss:$0 sm:$0xff] }
  0xb3   :  { %1237 = vmatpush3.bf16.msra.mxu1 %v1375_v57  ;;  %1216 = vmatprep.subr.bf16.mxu0 %v1376_v58 }
  0xb4   :  { %1238 = vmatprep.subr.bf16.mxu1 %v1377_v59 }
  0xb6   :  { %1217 = vmatpush3.bf16.msra.mxu0 %v1378_v60 }
  0xb7   :  { %1239 = vmatpush3.bf16.msra.mxu1 %v1379_v61  ;;  %1218 = vmatprep.subr.bf16.mxu0 %v1380_v62 }
  0xb8   :  { %1240 = vmatprep.subr.bf16.mxu1 %v1381_v63 }
  0xba   :  { %1219 = vmatpush3.bf16.msra.mxu0 %v1382_v0  ;;  %v1153_v0 = vld [vmem:[#allocation13] ss:$0 sm:$0xff] }
  0xbb   :  { %1241 = vmatpush3.bf16.msra.mxu1 %v1383_v1  ;;  %1220 = vmatprep.subr.bf16.mxu0 %v1384_v2 }
  0xbc   :  { %1242 = vmatprep.subr.bf16.mxu1 %v1385_v3 }
  0xbe   :  { %1221 = vmatpush3.bf16.msra.mxu0 %v1386_v4 }
  0xbf   :  { %1243 = vmatpush3.bf16.msra.mxu1 %v1387_v5  ;;  %1268 = vmatprep.subr.bf16.mxu0 %v1603_v13 }
  0xc0   :  { %1288 = vmatprep.subr.bf16.mxu1 %v1603_v13 }
  0xc1   :  { %779 = vmatmul.mubr.bf16.vlgmr.msra.gmra.mrb[4].mxu0 %v1076_v7 }
  0xc2   :  { %819 = vmatmul.mubr.bf16.vlgmr.msra.gmra.mrb[4].mxu1 %v1078_v10  ;;  %1269 = vmatpush3.bf16.msra.mxu0 %v1392_v12 }
  0xc3   :  { %1270 = vmatprep.subr.bf16.mxu0 %v1603_v13  ;;  %1284 = vmatprep.mubr.msk.bf16.mxu0 %vm1604_vm0, %v1603_v13 }
  0xc4   :  { %1304 = vmatprep.mubr.msk.bf16.mxu1 %vm1604_vm0, %v1603_v13  ;;  %1289 = vmatpush3.bf16.msra.mxu1 %v1400_v21 }
  0xc5   :  { %1290 = vmatprep.subr.bf16.mxu1 %v1603_v13 }
  0xc6   :  { %1271 = vmatpush3.bf16.msra.mxu0 %v1393_v14 }
  0xc7   :  { %1272 = vmatprep.subr.bf16.mxu0 %v1603_v13 }
  0xc8   :  { %1291 = vmatpush3.bf16.msra.mxu1 %v1401_v22 }
  0xc9   :  { %1292 = vmatprep.subr.bf16.mxu1 %v1603_v13 }
  0xca   :  { %1273 = vmatpush3.bf16.msra.mxu0 %v1394_v15 }
  0xcb   :  { %1274 = vmatprep.subr.bf16.mxu0 %v1603_v13 }
  0xcc   :  { %1293 = vmatpush3.bf16.msra.mxu1 %v1402_v23 }
  0xcd   :  { %1294 = vmatprep.subr.bf16.mxu1 %v1603_v13 }
  0xce   :  { %1275 = vmatpush3.bf16.msra.mxu0 %v1395_v16 }
  0xcf   :  { %1276 = vmatprep.subr.bf16.mxu0 %v1603_v13 }
  0xd0   :  { %1295 = vmatpush3.bf16.msra.mxu1 %v1403_v24 }
  0xd1   :  { %1296 = vmatprep.subr.bf16.mxu1 %v1603_v13 }
  0xd2   :  { %1277 = vmatpush3.bf16.msra.mxu0 %v1396_v17 }
  0xd3   :  { %1278 = vmatprep.subr.bf16.mxu0 %v1603_v13 }
  0xd4   :  { %1297 = vmatpush3.bf16.msra.mxu1 %v1404_v25 }
  0xd5   :  { %1298 = vmatprep.subr.bf16.mxu1 %v1603_v13 }
  0xd6   :  { %1279 = vmatpush3.bf16.msra.mxu0 %v1397_v18 }
  0xd7   :  { %1280 = vmatprep.subr.bf16.mxu0 %v1603_v13 }
  0xd8   :  { %1299 = vmatpush3.bf16.msra.mxu1 %v1405_v26 }
  0xd9   :  { %1300 = vmatprep.subr.bf16.mxu1 %v1603_v13 }
  0xda   :  { %1281 = vmatpush3.bf16.msra.mxu0 %v1398_v19 }
  0xdb   :  { %1282 = vmatprep.subr.bf16.mxu0 %v1603_v13 }
  0xdc   :  { %1301 = vmatpush3.bf16.msra.mxu1 %v1406_v54 }
  0xdd   :  { %1302 = vmatprep.subr.bf16.mxu1 %v1603_v13 }
  0xde   :  { %1283 = vmatpush3.bf16.msra.mxu0 %v1399_v20 }
  0xe0   :  { %1303 = vmatpush3.bf16.msra.mxu1 %v1407_v55 }
 0x174   :  { %v1178_v27 = vpop.f32.mrb[0].mxu0 }
 0x175   :  { %v1200_v28 = vpop.f32.mrb[0].mxu1  ;;  %v1179_v30 = vpop.f32.mrb[1].mxu0 }
 0x176   :  { %v1201_v31 = vpop.f32.mrb[1].mxu1  ;;  %v1180_v32 = vadd.f32 %v1179_v30, %v1178_v27  ;;  %v1181_v34 = vpop.f32.mrb[2].mxu0 }
 0x177   :  { %v1202_v33 = vadd.f32 %v1201_v31, %v1200_v28  ;;  %v1203_v35 = vpop.f32.mrb[2].mxu1  ;;  %v1182_v36 = vpop.f32.mrb[3].mxu0 }
 0x178   :  { %v1204_v37 = vpop.f32.mrb[3].mxu1  ;;  %v701_v38 = vadd.f32 %v1180_v32, %v1071_v29 }
 0x17a   :  { %v741_v39 = vadd.f32 %v1202_v33, %v701_v38 }
 0x194   :  { %v1222_v40 = vpop.f32.mrb[4].mxu0 }
 0x195   :  { %v1244_v41 = vpop.f32.mrb[4].mxu1  ;;  %v1223_v42 = vpop.f32.mrb[5].mxu0 }
 0x196   :  { %v1245_v43 = vpop.f32.mrb[5].mxu1  ;;  %v1224_v44 = vadd.f32 %v1223_v42, %v1222_v40  ;;  %v1225_v46 = vpop.f32.mrb[6].mxu0 }
 0x197   :  { %v1246_v45 = vadd.f32 %v1245_v43, %v1244_v41  ;;  %v1247_v47 = vpop.f32.mrb[6].mxu1  ;;  %v1226_v48 = vpop.f32.mrb[7].mxu0 }
 0x198   :  { %v1248_v49 = vpop.f32.mrb[7].mxu1  ;;  %v781_v50 = vadd.f32 %v1224_v44, %v741_v39 }
 0x19a   :  { %v821_v51 = vadd.f32 %v1246_v45, %v781_v50 }
 0x19c   :  { %v826_v52 = vmax.f32 %v821_v51, 0.0 }
 0x19e   :  { %v827_v53 = vpack.c.bf16 %v826_v52, %v826_v52 }
 0x1a0   :  { %1285 = vmatmul.mubr.bf16.vlgmr.msra.gmra.mrb[8].mxu0 %v827_v53 }
 0x273   :  { %v933_v57 = vpop.f32.mrb[8].mxu0 }
 0x274   :  { %v934_v58 = vadd.f32 %v1144_v56, %v933_v57  ;;  %v1286_v59 = vpop.f32.mrb[9].mxu0 }
 0x275   :  { %v936_v60 = vpop.f32.mrb[10].mxu0 }
 0x276   :  { %v939_v61 = vmax.f32 %v934_v58, 0.0  ;;  %v1287_v62 = vpop.f32.mrb[11].mxu0 }
 0x278   :  { %v940_v63 = vpack.c.bf16 %v939_v61, %v939_v61 }
 0x27a   :  { %1305 = vmatmul.mubr.bf16.vlgmr.msra.gmra.mrb[8].mxu1 %v940_v63 }
 0x34d   :  { %v1046_v1 = vpop.f32.mrb[8].mxu1 }
 0x34e   :  { %v1047_v2 = vadd.f32 %v1153_v0, %v1046_v1  ;;  %v1306_v3 = vpop.f32.mrb[9].mxu1 }
 0x34f   :  { %v1049_v4 = vpop.f32.mrb[10].mxu1 }
 0x350   :  { %1052 = vst [vmem:[#allocation14] sm:$0xff] %v1047_v2  ;;  %v1307_v5 = vpop.f32.mrb[11].mxu1 }
 0x351   :  { %1573 = shalt.err (!%p1570_p4)
}
 0x352   :  { %s1574_s15 = scalar_lea.hbm %s1776_s7, 128 }
 0x353   :  { %p1575_p5 = scmp.ne.s32.totalorder %s1776_s7, %s1574_s15  ;;  %p1578_p6 = scmp.lt.u32.totalorder %s1574_s15, %s1776_s7 }
 0x355   :  { %p1580_p7 = pnand %p1578_p6, %p1575_p5 }
 0x357   :  { %1583 = shalt.err (!%p1580_p7)
}
 0x358   :  { %1062 = dma.vmem_to_hbm [thread:$0]  %s1060_s13, 128, %s1776_s7, [#allocation4]  }
 0x359   :  { %1592 = dma.done.wait [#allocation4], 128  }
 0x35a   :  { %1593 = vsyncadd [#allocation4], 4294967168 }
 0x35b   :  { %1066 = vsyncpa [#allocation3], 1 }
 0x35c   :  { %1067 = vsyncpa [#allocation6], 1 }
 0x35d   :  { %1068 = vsyncpa [#allocation9], 1 }
 0x35e   :  { %1069 = vsyncpa [#allocation12], 1 }
 0x35f   :  { %1070 = vsyncpa [#allocation4], 1 }

</bundles_post_ra>
